<compile_context>
chip_gen: v7x
topology: tpu7x:2x2x1
jax: 0.10.0
libtpu: 0.0.40
codegen_flags: <defaults>
</compile_context>

<pallas_src>
import functools

import jax
import jax.numpy as jnp
from jax import lax
from jax.experimental import pallas as pl
from jax.experimental.pallas import tpu as pltpu


def _focal_loss_kernel(logits_ref, tgt_ref, out_ref, acc_ref, *,
                       alpha, gamma, hw_valid, tile_hw, targets_are_indices):
    hw = pl.program_id(1)

    @pl.when(hw == 0)
    def _init():
        acc_ref[...] = jnp.zeros_like(acc_ref)

    x = logits_ref[...].astype(jnp.float32)            # (C, tile_hw)
    num_classes = x.shape[0]
    cls = lax.broadcasted_iota(jnp.int32, x.shape, 0)  # class id per sublane

    if targets_are_indices:
        idx = tgt_ref[...].astype(jnp.int32)           # (1, tile_hw)
    else:
        t = tgt_ref[...].astype(jnp.float32)           # (C, tile_hw)
        tmax = jnp.max(t, axis=0, keepdims=True)
        # first maximal class (matches torch.argmax tie behavior)
        idx = jnp.min(jnp.where(t == tmax, cls, jnp.int32(num_classes)),
                      axis=0, keepdims=True)           # (1, tile_hw)

    picked = jnp.sum(jnp.where(cls == idx, x, 0.0), axis=0,
                     keepdims=True)                    # logits[target]

    # stable softmax pieces; ce = log(sum_exp) - (picked - m)
    m = jnp.max(x, axis=0, keepdims=True)
    sumexp = jnp.sum(jnp.exp(x - m), axis=0, keepdims=True)
    z = picked - m
    ce = jnp.log(sumexp) - z                           # (1, tile_hw)
    # pt = softmax prob of the target class (== exp(-ce)); one exp saved,
    # reciprocal goes to the otherwise-free EUP vrcp slot.
    pt = jnp.exp(z) * pl.reciprocal(sumexp, approx=True)

    one_m_pt = jnp.maximum(1.0 - pt, 0.0)
    g = float(gamma)
    if g == 2.0:                                       # module default: square on VALU
        w = one_m_pt * one_m_pt
    elif g.is_integer() and 0.0 <= g <= 8.0:           # small integer gamma: mul chain
        w = jnp.ones_like(one_m_pt)
        for _ in range(int(g)):
            w = w * one_m_pt
    else:                                              # general gamma: pow (EUP)
        w = one_m_pt ** g

    fl = (float(alpha) * w) * ce                       # (1, tile_hw)

    if hw_valid % tile_hw != 0:
        # only emitted when the last hw tile is partial
        lane = lax.broadcasted_iota(jnp.int32, fl.shape, 1)
        fl = jnp.where(hw * tile_hw + lane < hw_valid, fl, 0.0)

    acc_ref[...] = acc_ref[...] + fl                   # lane-wise, no per-step reduce

    @pl.when(hw == pl.num_programs(1) - 1)
    def _finalize():
        out_ref[...] = jnp.sum(acc_ref[...], axis=-1, keepdims=True)   # (1, 1)


def focal_loss(logits, targets, alpha=1.0, gamma=2.0, reduction='mean'):
    """Pallas TPU focal loss.

    logits:  (N, C, H, W), any float dtype (cast to f32 in-kernel).
    targets: (N, C, H, W) score maps (argmax'd over C, as in the PyTorch
             module) or (N, H, W) integer class indices.
    """
    N, C, H, W = logits.shape
    HW = H * W

    # free reshape: contiguous H,W dims merged, no transpose / copy pass
    logits3 = logits.reshape(N, C, HW)

    targets_are_indices = (targets.ndim != 4)
    if targets_are_indices:
        tgt3 = targets.reshape(N, 1, HW).astype(jnp.int32)
    else:
        tgt3 = targets.reshape(N, C, HW)

    # pixels on the 128-wide lane axis; cap the lane tile so 2 inputs x 2
    # pipeline buffers stay well inside every generation's scoped VMEM
    # (~1 MiB per input buffer worst case).
    max_lane = max(128, min(8192, ((1 << 18) // max(C, 1)) // 128 * 128))
    tile_hw = HW if HW <= max_lane else max_lane
    n_hw = pl.cdiv(HW, tile_hw)

    tgt_block = (None, 1, tile_hw) if targets_are_indices else (None, C, tile_hw)

    kernel = functools.partial(
        _focal_loss_kernel, alpha=float(alpha), gamma=float(gamma),
        hw_valid=HW, tile_hw=tile_hw, targets_are_indices=targets_are_indices)

    partials = pl.pallas_call(
        kernel,
        out_shape=jax.ShapeDtypeStruct((N, 1, 1), jnp.float32),
        grid_spec=pltpu.PrefetchScalarGridSpec(
            num_scalar_prefetch=0,
            grid=(N, n_hw),
            in_specs=[
                pl.BlockSpec((None, C, tile_hw), lambda n, hw: (n, 0, hw)),
                pl.BlockSpec(tgt_block, lambda n, hw: (n, 0, hw)),
            ],
            out_specs=pl.BlockSpec((None, 1, 1), lambda n, hw: (n, 0, 0)),
            scratch_shapes=[pltpu.VMEM((1, tile_hw), jnp.float32)],
        ),
        compiler_params=pltpu.CompilerParams(
            dimension_semantics=("parallel", "arbitrary")),
    )(logits3, tgt3)

    total = jnp.sum(partials)
    if reduction == 'mean':
        return total / jnp.float32(N * HW)
    elif reduction == 'sum':
        return total
    # TODO(synk): reduction='none' (per-pixel (N,H,W) output) not wired up;
    # only 'mean' (module default) and 'sum' are implemented in-kernel.
    raise NotImplementedError("reduction='none' not implemented in Pallas kernel")


def _focal_loss_ref(logits_nchw, targets, alpha=1.0, gamma=2.0):
    # pure-JAX reference of the PyTorch forward
    if targets.ndim == 4:
        tgt = jnp.argmax(targets, axis=1)                              # (N,H,W)
    else:
        tgt = targets
    logp = jax.nn.log_softmax(logits_nchw.astype(jnp.float32), axis=1)
    ce = -jnp.take_along_axis(logp, tgt[:, None], axis=1)[:, 0]        # (N,H,W)
    pt = jnp.exp(-ce)
    fl = alpha * (1.0 - pt) ** gamma * ce
    return fl.mean()


if __name__ == "__main__":
    key = jax.random.PRNGKey(0)
    k1, k2 = jax.random.split(key)
    N, C, H, W = 2, 4, 16, 16
    logits = jax.random.normal(k1, (N, C, H, W), dtype=jnp.float32)
    tgt_idx = jax.random.randint(k2, (N, H, W), 0, C)
    # 4-D "target scores" (e.g. one-hot / soft masks), argmax'd inside forward
    targets4d = jnp.transpose(jax.nn.one_hot(tgt_idx, C, dtype=jnp.float32),
                              (0, 3, 1, 2))                            # (N,C,H,W)

    ref = _focal_loss_ref(logits, targets4d)

    # 4-D score targets (argmax'd in-kernel), module-default mean reduction
    out4 = jax.block_until_ready(focal_loss(logits, targets4d,
                                            alpha=1.0, gamma=2.0,
                                            reduction='mean'))
    assert jnp.allclose(out4, ref, rtol=2e-3, atol=1e-5), (out4, ref)

    # 3-D integer class-index targets (no one-hot materialized in HBM)
    out3 = jax.block_until_ready(focal_loss(logits, tgt_idx,
                                            alpha=1.0, gamma=2.0,
                                            reduction='mean'))
    assert jnp.allclose(out3, ref, rtol=2e-3, atol=1e-5), (out3, ref)

    print("KERNEL_OK")
</pallas_src>

<mosaic_0001>
module attributes {stable_mosaic.version = 11 : i64} {
  func.func @_focal_loss_kernel(%arg0: i32, %arg1: i32, %arg2: memref<1x4x256xf32, #tpu.memory_space<vmem>>, %arg3: memref<1x4x256xf32, #tpu.memory_space<vmem>>, %arg4: memref<1x1x1xf32, #tpu.memory_space<vmem>>, %arg5: memref<1x256xf32, #tpu.memory_space<vmem>>) attributes {dimension_semantics = [#tpu.dimension_semantics<parallel>, #tpu.dimension_semantics<arbitrary>], iteration_bounds = array<i64: 2, 1>, scalar_prefetch = 0 : i64, scratch_operands = 1 : i64, tpu.core_type = #tpu.core_type<tc>, window_params = [{transform_indices = @transform_0, window_bounds = array<i64: 1, 4, 256>}, {transform_indices = @transform_1, window_bounds = array<i64: 1, 4, 256>}, {transform_indices = @transform_2, window_bounds = array<i64: 1, 1, 1>}]} {
    %c0_i32 = arith.constant 0 : i32
    %0 = arith.cmpi eq, %arg1, %c0_i32 : i32
    %1 = arith.extui %0 : i1 to i32
    %c0_i32_0 = arith.constant 0 : i32
    %2 = arith.cmpi ne, %1, %c0_i32_0 : i32
    scf.if %2 {
      %cst_20 = arith.constant 0.000000e+00 : f32
      %49 = vector.broadcast %cst_20 : f32 to vector<1x256xf32>
      %c0_21 = arith.constant 0 : index
      %c0_22 = arith.constant 0 : index
      %50 = vector.load %arg5[%c0_21, %c0_22] : memref<1x256xf32, #tpu.memory_space<vmem>>, vector<1x256xf32>
      tpu.vector_store %arg5[%c0_21, %c0_22], %49 {strides = array<i32>} : memref<1x256xf32, #tpu.memory_space<vmem>>, vector<1x256xf32>,
    } else {
    }
    %c0 = arith.constant 0 : index
    %c0_1 = arith.constant 0 : index
    %c0_2 = arith.constant 0 : index
    %3 = vector.load %arg2[%c0, %c0_1, %c0_2] : memref<1x4x256xf32, #tpu.memory_space<vmem>>, vector<1x4x256xf32>
    %4 = vector.shape_cast %3 : vector<1x4x256xf32> to vector<4x256xf32>
    %5 = tpu.iota {dimensions = array<i32: 0>} : vector<4x256xi32>
    %c0_3 = arith.constant 0 : index
    %c0_4 = arith.constant 0 : index
    %c0_5 = arith.constant 0 : index
    %6 = vector.load %arg3[%c0_3, %c0_4, %c0_5] : memref<1x4x256xf32, #tpu.memory_space<vmem>>, vector<1x4x256xf32>
    %7 = vector.shape_cast %6 : vector<1x4x256xf32> to vector<4x256xf32>
    %cst = arith.constant dense<0xFF800000> : vector<256xf32>
    %8 = vector.multi_reduction <maximumf>, %7, %cst [0] : vector<4x256xf32> to vector<256xf32>
    %9 = vector.shape_cast %8 : vector<256xf32> to vector<1x256xf32>
    %10 = vector.broadcast %9 : vector<1x256xf32> to vector<4x256xf32>
    %11 = arith.cmpf oeq, %7, %10 : vector<4x256xf32>
    %c4_i32 = arith.constant 4 : i32
    %12 = vector.broadcast %c4_i32 : i32 to vector<4x256xi32>
    %13 = arith.select %11, %5, %12 : vector<4x256xi1>, vector<4x256xi32>
    %cst_6 = arith.constant dense<2147483647> : vector<256xi32>
    %14 = vector.multi_reduction <minsi>, %13, %cst_6 [0] : vector<4x256xi32> to vector<256xi32>
    %15 = vector.shape_cast %14 : vector<256xi32> to vector<1x256xi32>
    %16 = vector.broadcast %15 : vector<1x256xi32> to vector<4x256xi32>
    %17 = arith.cmpi eq, %5, %16 : vector<4x256xi32>
    %cst_7 = arith.constant 0.000000e+00 : f32
    %18 = vector.broadcast %cst_7 : f32 to vector<4x256xf32>
    %19 = arith.select %17, %4, %18 : vector<4x256xi1>, vector<4x256xf32>
    %cst_8 = arith.constant dense<0.000000e+00> : vector<256xf32>
    %20 = vector.multi_reduction <add>, %19, %cst_8 [0] : vector<4x256xf32> to vector<256xf32>
    %21 = vector.shape_cast %20 : vector<256xf32> to vector<1x256xf32>
    %cst_9 = arith.constant dense<0xFF800000> : vector<256xf32>
    %22 = vector.multi_reduction <maximumf>, %4, %cst_9 [0] : vector<4x256xf32> to vector<256xf32>
    %23 = vector.shape_cast %22 : vector<256xf32> to vector<1x256xf32>
    %24 = vector.broadcast %23 : vector<1x256xf32> to vector<4x256xf32>
    %25 = arith.subf %4, %24 : vector<4x256xf32>
    %26 = math.exp %25 : vector<4x256xf32>
    %cst_10 = arith.constant dense<0.000000e+00> : vector<256xf32>
    %27 = vector.multi_reduction <add>, %26, %cst_10 [0] : vector<4x256xf32> to vector<256xf32>
    %28 = vector.shape_cast %27 : vector<256xf32> to vector<1x256xf32>
    %29 = arith.subf %21, %23 : vector<1x256xf32>
    %30 = math.log %28 : vector<1x256xf32>
    %31 = arith.subf %30, %29 : vector<1x256xf32>
    %32 = math.exp %29 : vector<1x256xf32>
    %33 = tpu.reciprocal %28 {approx = true} : vector<1x256xf32> -> vector<1x256xf32>
    %34 = arith.mulf %32, %33 : vector<1x256xf32>
    %cst_11 = arith.constant 1.000000e+00 : f32
    %35 = vector.broadcast %cst_11 : f32 to vector<1x256xf32>
    %36 = arith.subf %35, %34 : vector<1x256xf32>
    %cst_12 = arith.constant 0.000000e+00 : f32
    %37 = vector.broadcast %cst_12 : f32 to vector<1x256xf32>
    %38 = arith.maximumf %36, %37 : vector<1x256xf32>
    %39 = arith.mulf %38, %38 : vector<1x256xf32>
    %cst_13 = arith.constant 1.000000e+00 : f32
    %40 = vector.broadcast %cst_13 : f32 to vector<1x256xf32>
    %41 = arith.mulf %40, %39 : vector<1x256xf32>
    %42 = arith.mulf %41, %31 : vector<1x256xf32>
    %c0_14 = arith.constant 0 : index
    %c0_15 = arith.constant 0 : index
    %43 = vector.load %arg5[%c0_14, %c0_15] : memref<1x256xf32, #tpu.memory_space<vmem>>, vector<1x256xf32>
    %44 = arith.addf %43, %42 : vector<1x256xf32>
    %c0_16 = arith.constant 0 : index
    %c0_17 = arith.constant 0 : index
    %45 = vector.load %arg5[%c0_16, %c0_17] : memref<1x256xf32, #tpu.memory_space<vmem>>, vector<1x256xf32>
    tpu.vector_store %arg5[%c0_16, %c0_17], %44 {strides = array<i32>} : memref<1x256xf32, #tpu.memory_space<vmem>>, vector<1x256xf32>,
    %c0_i32_18 = arith.constant 0 : i32
    %46 = arith.cmpi eq, %arg1, %c0_i32_18 : i32
    %47 = arith.extui %46 : i1 to i32
    %c0_i32_19 = arith.constant 0 : i32
    %48 = arith.cmpi ne, %47, %c0_i32_19 : i32
    scf.if %48 {
      %c0_20 = arith.constant 0 : index
      %c0_21 = arith.constant 0 : index
      %49 = vector.load %arg5[%c0_20, %c0_21] : memref<1x256xf32, #tpu.memory_space<vmem>>, vector<1x256xf32>
      %cst_22 = arith.constant dense<0.000000e+00> : vector<1xf32>
      %50 = vector.multi_reduction <add>, %49, %cst_22 [1] : vector<1x256xf32> to vector<1xf32>
      %51 = vector.shape_cast %50 : vector<1xf32> to vector<1x1xf32>
      %c0_23 = arith.constant 0 : index
      %c0_24 = arith.constant 0 : index
      %c0_25 = arith.constant 0 : index
      %52 = vector.load %arg4[%c0_23, %c0_24, %c0_25] : memref<1x1x1xf32, #tpu.memory_space<vmem>>, vector<1x1x1xf32>
      %53 = vector.shape_cast %52 : vector<1x1x1xf32> to vector<1x1xf32>
      %54 = vector.shape_cast %51 : vector<1x1xf32> to vector<1x1x1xf32>
      tpu.vector_store %arg4[%c0_23, %c0_24, %c0_25], %54 {strides = array<i32>} : memref<1x1x1xf32, #tpu.memory_space<vmem>>, vector<1x1x1xf32>,
    } else {
    }
    return
  }
  func.func @transform_0(%arg0: i32, %arg1: i32) -> (i32, i32, i32) {
    %c0_i32 = arith.constant 0 : i32
    %c0_i32_0 = arith.constant 0 : i32
    return %arg0, %c0_i32, %arg1 : i32, i32, i32
  }
  func.func @transform_1(%arg0: i32, %arg1: i32) -> (i32, i32, i32) {
    %c0_i32 = arith.constant 0 : i32
    %c0_i32_0 = arith.constant 0 : i32
    return %arg0, %c0_i32, %arg1 : i32, i32, i32
  }
  func.func @transform_2(%arg0: i32, %arg1: i32) -> (i32, i32, i32) {
    %c0_i32 = arith.constant 0 : i32
    %c0_i32_0 = arith.constant 0 : i32
    %c0_i32_1 = arith.constant 0 : i32
    return %arg0, %c0_i32, %c0_i32_0 : i32, i32, i32
  }
}

</mosaic_0001>

<bundles_post_ra>
// kernel: tpu_custom_call.1
= control target key start
LH: loop header
LB: loop body
LE: loop exit
PB: predicated region body
PF: predicated region fallthrough
CT: control target
= control target key end

     0   :  { %7 = vsyncpa [#allocation4], 0  ;;  %s960_s0 = inlined_call_operand.hbm [shape: f32[2,4,256], index: 0, kind: input, shape index: {}]   ;;  %s961_s1 = inlined_call_operand.hbm [shape: f32[2,4,256], index: 1, kind: input, shape index: {}]   ;;  %s962_s2 = inlined_call_operand.vmem [shape: f32[2,1,1], index: 2, kind: output, shape index: {}]  }
   0x1   :  { %9 = vsyncpa [#allocation4 + $0x1], 0 }
   0x2   :  { %10 = vsyncpa [#allocation6], 0 }
   0x3   :  { %12 = vsyncpa [#allocation6 + $0x1], 0  ;;  %s742_s9 = smov 0   ;;  %s744_s10 = smov 0  }
   0x4   :  { %s746_s11 = smov 0   ;;  %s748_s12 = smov 0  }
   0x5   :  { %s750_s13 = smov 0   ;;  %s752_s14 = smov 0  }
   0x6 LB: > { %s510_s15 = sadd.s32 4294967295, %s720_s14   ;;  %s30_s16 = sadd.s32 1, %s716_s13  ;;  %s720_s14 = sphi %s752_s14, %s18_s14   ;;  %s716_s13 = sphi %s750_s13, %s978_s13   ;;  %s712_s12 = sphi %s748_s12, %s977_s12   ;;  %s708_s11 = sphi %s746_s11, %s976_s11   ;;  %s704_s10 = sphi %s744_s10, %s975_s10   ;;  %s700_s9 = sphi %s742_s9, %s974_s9  }
   0x7   : > { %p32_p0 = scmp.ge.s32.totalorder %s30_s16, 2  ;;  %s39_s17 = sadd.s32 1, %s708_s11 }
   0x8   : > { %p46_p1 = scmp.ne.s32.totalorder %s708_s11, %s704_s10  ;;  %p47_p2 = scmp.eq.s32.totalorder %s720_s14, 0 }
   0x9   : > { %s980_s16 = smov (%p32_p0, %s30_s16), 0  ;;  %p52_p4 = scmp.ne.s32.totalorder %s704_s10, %s700_s9 }
   0xa   : > { %p778_p3 = por %p47_p2, %p46_p1  ;;  %s34_s19 = ssub.s32 %s716_s13, %s980_s16 }
   0xb   : > { %p53_p5 = scmp.eq.s32.totalorder %s510_s15, 0  ;;  %p37_p6 = scmp.eq.s32.totalorder %s34_s19, 0 }
   0xc   : > { %p538_p8 = scmp.lt.s32.totalorder %s720_s14, 2  ;;  %s794_s22 = sand.u32 1, %s708_s11  }
   0xd   : > { %p785_p7 = por %p53_p5, %p52_p4  ;;  %s525_s23 = sshll.u32 %s716_s13, 7 }
   0xe   : > { %s791_s21 = scalar_select %p37_p6, %s708_s11, %s39_s17  }
   0xf   : > { %s965_s20 = scalar_select %p785_p7, 1, 0 }
  0x10   : > { %s514_s24 = sshll.u32 %s794_s22, 3  ;;  %s803_s27 = scalar_lea.hbm %s960_s0, %s525_s23 }
  0x11   : > { %s134_s28 = scalar_lea.vmem [#allocation3], %s514_s24  ;;  %p809_p9 = pnand %p538_p8, %p778_p3 }
  0x12   : > { %s144_s29 = sshll.u32 %s134_s28, 4  ;;  %s131_s3 = scalar_lea.sflag [#allocation4], %s794_s22  ;;  %s813_s29 = int_to_ptr.vmem [resolvable:$true] %s144_s29 }
  0x13   : > { %s606_s4 = scalar_lea.hbm %s803_s27, 128  ;;  %p608_p13 = pneg %p809_p9 }
  0x14   : > { %p607_p12 = scmp.ne.s32.totalorder %s803_s27, %s606_s4  ;;  %s611_s7 = scalar_lea.hbm %s960_s0, 256 }
  0x15   : > { %p612_p2 = scmp.lt.u32.totalorder %s803_s27, %s960_s0  ;;  %p613_p3 = scmp.lt.u32.totalorder %s611_s7, %s606_s4 }
  0x16   : > { %p609_p0 = pnand %p608_p13, %p607_p12  ;;  %p615_p5 = scmp.lt.u32.totalorder %s606_s4, %s803_s27 }
  0x17   : > { %p614_p4 = por %p613_p3, %p612_p2 }
  0x18   : > { %p610_p1 = pneg %p609_p0 }
  0x19   : > { %p616_p6 = por %p615_p5, %p614_p4 }
  0x1b   : > { %p617_p8 = pnand %p616_p6, %p610_p1 }
  0x1d   : > { %620 = shalt.err (!%p617_p8)
}
  0x1e   : > { %s621_s15 = scalar_lea.vmem %s813_s29, 128  ;;  %s722_s17 = smov [#allocation3]  }
  0x1f   : > { %p622_p12 = scmp.ne.s32.totalorder %s813_s29, %s621_s15  ;;  %s626_s18 = sshll.u32 %s722_s17, 4  ;;  %s627_s18 = int_to_ptr.vmem [resolvable:$false] %s626_s18 }
  0x20   : > { %s628_s19 = scalar_lea.vmem %s627_s18, 256  ;;  %p629_p11 = scmp.lt.s32.totalorder %s813_s29, %s627_s18 }
  0x21   : > { %p624_p0 = pnand %p622_p12, %p608_p13  ;;  %p630_p2 = scmp.lt.s32.totalorder %s628_s19, %s621_s15 }
  0x23   : > { %p625_p10 = pneg %p624_p0  ;;  %p631_p3 = por %p630_p2, %p629_p11 }
  0x25   : > { %p632_p4 = pnand %p631_p3, %p625_p10 }
  0x27   : > { %635 = shalt.err (!%p632_p4)
}
  0x28   : > { %534 = dma.hbm_to_vmem [thread:$0]  (!%p809_p9), %s803_s27, 128, %s813_s29, %s131_s3  }
  0x29   : > { %p967_p1 = scmp.lt.s32.totalorder %s720_s14, 3  ;;  %p968_p5 = scmp.ge.s32.totalorder %s720_s14, 1 }
  0x2a   : > { %s856_s4 = scalar_lea.hbm %s961_s1, %s525_s23  ;;  %s155_s5 = scalar_lea.vmem [#allocation5], %s514_s24 }
  0x2b   : > { %p847_p6 = pnand %p968_p5, %p967_p1  ;;  %s165_s6 = sshll.u32 %s155_s5, 4  ;;  %s166_s6 = int_to_ptr.vmem [resolvable:$true] %s165_s6 }
  0x2c   : > { %s152_s27 = scalar_lea.sflag [#allocation6], %s794_s22  ;;  %s636_s29 = scalar_lea.hbm %s856_s4, 128 }
  0x2d   : > { %s969_s25 = scalar_select %p847_p6, 1, 0 }
  0x2e   : > { %p637_p10 = scmp.ne.s32.totalorder %s856_s4, %s636_s29  ;;  %s641_s23 = scalar_lea.hbm %s961_s1, 256 }
  0x2f   : > { %p642_p12 = scmp.lt.u32.totalorder %s856_s4, %s961_s1  ;;  %p643_p0 = scmp.lt.u32.totalorder %s641_s23, %s636_s29 }
  0x30   : > { %p639_p11 = pnand %p637_p10, %p608_p13  ;;  %p645_p3 = scmp.lt.u32.totalorder %s636_s29, %s856_s4 }
  0x31   : > { %p644_p2 = por %p643_p0, %p642_p12 }
  0x32   : > { %p640_p8 = pneg %p639_p11 }
  0x33   : > { %p646_p4 = por %p645_p3, %p644_p2 }
  0x35   : > { %p647_p1 = pnand %p646_p4, %p640_p8 }
  0x37   : > { %650 = shalt.err (!%p647_p1)
}
  0x38   : > { %s651_s22 = scalar_lea.vmem %s166_s6, 128  ;;  %s723_s24 = smov [#allocation5]  }
  0x39   : > { %p652_p5 = scmp.ne.s32.totalorder %s166_s6, %s651_s22  ;;  %s656_s15 = sshll.u32 %s723_s24, 4  ;;  %s657_s15 = int_to_ptr.vmem [resolvable:$false] %s656_s15 }
  0x3a   : > { %s658_s17 = scalar_lea.vmem %s657_s15, 256  ;;  %p659_p7 = scmp.lt.s32.totalorder %s166_s6, %s657_s15 }
  0x3b   : > { %p654_p10 = pnand %p652_p5, %p608_p13  ;;  %p660_p6 = scmp.lt.s32.totalorder %s658_s17, %s651_s22 }
  0x3d   : > { %p655_p11 = pneg %p654_p10  ;;  %p661_p0 = por %p660_p6, %p659_p7 }
  0x3f   : > { %p662_p12 = pnand %p661_p0, %p655_p11 }
  0x41   : > { %665 = shalt.err (!%p662_p12)
}
  0x42   : > { %537 = dma.hbm_to_vmem [thread:$0]  (!%p809_p9), %s856_s4, 128, %s166_s6, %s152_s27  }
  0x43   : > { %p970_p8 = scmp.ne.s32.totalorder %s969_s25, 0 }
  0x44   : > { %s176_s18 = sand.u32 (!%p970_p8), 1, %s704_s10   ;;  %p971_p13 = scmp.ne.s32.totalorder (!%p970_p8), %s965_s20, 0 }
  0x45   : > { %174 = sbr.rel (%p970_p8) target bundleno = 318 (0x13e), region = 28  ;;  %s521_s19 = sshll.u32 (!%p970_p8), %s176_s18, 3 }
  0x46   : > { %s177_s26 = scalar_lea.sflag (!%p970_p8), [#allocation4], %s176_s18  ;;  %s180_s28 = scalar_lea.vmem (!%p970_p8), [#allocation3], %s521_s19 }
  0x4c   : > { %691 = dma.done.wait (%p971_p13), %s177_s26, 128  }
  0x4d   : > { %693 = vsyncadd (%p971_p13), %s177_s26, 4294967168  ;;  %s186_s5 = scalar_lea.sflag [#allocation6], %s176_s18  ;;  %s189_s29 = scalar_lea.vmem [#allocation5], %s521_s19 }
  0x4e   : > { %695 = dma.done.wait (%p971_p13), %s186_s5, 128  }
  0x4f   : > { %697 = vsyncadd (%p971_p13), %s186_s5, 4294967168  ;;  %v222_v0 = vlaneseq  ;;  %v724_v2 = vmov 0.0   ;;  %vm234_vm1 = vcmask 1043456   ;;  %v897_v3 = vld [vmem:[%s180_s28] sm:$0xff]  ;;  %v230_v4 = vld [vmem:[%s189_s29] sm:$0xff]  ;;  %vm406_vm11 = vcmask 1040384  }
  0x50   : > { %v232_v5 = vcombine.high %v230_v4, %v230_v4  ;;  %v235_v6 = vsel %vm234_vm1, %v230_v4, -inf  ;;  %v902_v7 = vcombine.high %v897_v3, %v897_v3  ;;  %v304_v8 = vsel %vm234_vm1, %v897_v3, -inf  ;;  %p215_p7 = scmp.lt.s32.totalorder %s712_s12, 1 }
  0x51   : > { %vm891_vm0 = vcmp.lt.s32.totalorder %v222_v0, 256  ;;  %v236_v9 = vrot.slane %v235_v6, 4  ;;  %v305_v10 = vrot.slane %v304_v8, 4  ;;  %v725_v12 = vmov 839922192  }
  0x52   : > { %226 = vst.msk [vmem:[#allocation2] sm:$0x3] %vm891_vm0, %v724_v2  ;;  %v242_v11 = vsel %vm234_vm1, %v232_v5, -inf  ;;  %v255_v13 = vunpack.c.l.s4 %v725_v12  ;;  %v311_v14 = vsel %vm234_vm1, %v902_v7, -inf  ;;  %v909_v23 = vshrl.u32 %v222_v0, 7  ;;  %s982_s12 = smov (!%p215_p7, %s712_s12), 1 }
  0x53   : > { %v237_v15 = vmax.f32 %v235_v6, %v236_v9  ;;  %v243_v16 = vrot.slane %v242_v11, 4  ;;  %v306_v17 = vmax.f32 %v304_v8, %v305_v10  ;;  %v312_v18 = vrot.slane %v311_v14, 4  ;;  %s217_s25 = scalar_lea.vmem %s962_s2, %s982_s12 }
  0x54   : > { %v256_v24 = vunpack.c.0.s8 %v255_v13  ;;  %vm412_vm12 = vcmask 0  }
  0x55   : > { %v238_v19 = vrot.slane %v237_v15, 2  ;;  %v244_v20 = vmax.f32 %v242_v11, %v243_v16  ;;  %v307_v21 = vrot.slane %v306_v17, 2  ;;  %v313_v22 = vmax.f32 %v311_v14, %v312_v18 }
  0x56   : > { %v259_v33 = vsub.s32 %v256_v24, %v909_v23 }
  0x57   : > { %v239_v25 = vmax.f32 %v237_v15, %v238_v19  ;;  %v245_v26 = vrot.slane %v244_v20, 2  ;;  %v308_v27 = vmax.f32 %v306_v17, %v307_v21  ;;  %v314_v28 = vrot.slane %v313_v22, 2 }
  0x58   : > { %v260_v40 = vrot.slane %v909_v23, %v259_v33 }
  0x59   : > { %v240_v29 = vrot.slane %v239_v25, 1  ;;  %v246_v30 = vmax.f32 %v244_v20, %v245_v26  ;;  %v309_v31 = vrot.slane %v308_v27, 1  ;;  %v315_v32 = vmax.f32 %v313_v22, %v314_v28 }
  0x5b   : > { %v241_v34 = vmax.f32 %v239_v25, %v240_v29  ;;  %v247_v35 = vrot.slane %v246_v30, 1  ;;  %v912_v36 = vmax.f32 %v308_v27, %v309_v31  ;;  %v316_v37 = vrot.slane %v315_v32, 1 }
  0x5d   : > { %v248_v38 = vmax.f32 %v246_v30, %v247_v35  ;;  %v914_v39 = vmax.f32 %v315_v32, %v316_v37 }
  0x5f   : > { %v251_v41 = vcombine.low %v241_v34, %v248_v38  ;;  %v320_v42 = vcombine.low %v912_v36, %v914_v39 }
  0x61   : > { %vm253_vm2 = vcmp.eq.f32.partialorder %v230_v4, %v251_v41  ;;  %v322_v43 = vsub.f32 %v897_v3, %v320_v42 }
  0x62   : > { %v261_v44 = vsel %vm253_vm2, %v260_v40, 4 }
  0x63   : > { %v262_v45 = vcombine.high %v261_v44, %v261_v44  ;;  %v263_v46 = vsel %vm234_vm1, %v261_v44, 2147483647  ;;  %v323_v47 = vmul.f32 1.442695, %v322_v43 }
  0x64   : > { %v264_v48 = vrot.slane %v263_v46, 4 }
  0x65   : > { %v273_v49 = vsel %vm234_vm1, %v262_v45, 2147483647  ;;  %592 = vpow2.f32 %v323_v47  ;;  %v726_v47 = vmov 1966171168  }
  0x66   : > { %vm265_vm3 = vcmp.lt.s32.totalorder %v263_v46, %v264_v48  ;;  %v274_v50 = vrot.slane %v273_v49, 4 }
  0x67   : > { %v266_v51 = vsel %vm265_vm3, %v263_v46, %v264_v48  ;;  %v371_v48 = vunpack.c.l.s4 %v726_v47 }
  0x68   : > { %v267_v52 = vrot.slane %v266_v51, 2  ;;  %vm275_vm4 = vcmp.lt.s32.totalorder %v273_v49, %v274_v50 }
  0x69   : > { %v276_v53 = vsel %vm275_vm4, %v273_v49, %v274_v50 }
  0x6a   : > { %vm268_vm5 = vcmp.lt.s32.totalorder %v266_v51, %v267_v52  ;;  %v277_v54 = vrot.slane %v276_v53, 2 }
  0x6b   : > { %v269_v55 = vsel %vm268_vm5, %v266_v51, %v267_v52 }
  0x6c   : > { %v270_v56 = vrot.slane %v269_v55, 1  ;;  %vm278_vm6 = vcmp.lt.s32.totalorder %v276_v53, %v277_v54 }
  0x6d   : > { %v279_v57 = vsel %vm278_vm6, %v276_v53, %v277_v54  ;;  %v372_v54 = vunpack.c.0.s8 %v371_v48 }
  0x6e   : > { %vm271_vm7 = vcmp.lt.s32.totalorder %v269_v55, %v270_v56  ;;  %v280_v58 = vrot.slane %v279_v57, 1 }
  0x6f   : > { %v593_v59 = vpop.eup %592  ;;  %v272_v60 = vsel %vm271_vm7, %v269_v55, %v270_v56 }
  0x70   : > { %vm281_vm8 = vcmp.lt.s32.totalorder %v279_v57, %v280_v58  ;;  %vm283_vm9 = vcmp.eq.s32.totalorder %v909_v23, %v272_v60  ;;  %v326_v61 = vcombine.high %v593_v59, %v593_v59  ;;  %v328_v62 = vsel %vm234_vm1, %v593_v59, 0.0 }
  0x71   : > { %v282_v63 = vsel %vm281_vm8, %v279_v57, %v280_v58  ;;  %v288_v0 = vsel %vm283_vm9, %v897_v3, 0.0  ;;  %v329_v2 = vrot.slane %v328_v62, 4  ;;  %v375_v58 = vsub.s32 %v372_v54, %v909_v23 }
  0x72   : > { %vm284_vm10 = vcmp.eq.s32.totalorder %v909_v23, %v282_v63  ;;  %v290_v4 = vsel %vm234_vm1, %v288_v0, 0.0  ;;  %v335_v5 = vsel %vm234_vm1, %v326_v61, 0.0  ;;  %v366_v61 = vld [vmem:[#allocation2] sm:$0x3]  ;;  %v398_v0 = vsub.s32 0, %v909_v23 }
  0x73   : > { %v289_v6 = vsel %vm284_vm10, %v902_v7, 0.0  ;;  %v291_v8 = vrot.slane %v290_v4, 4  ;;  %v330_v9 = vadd.f32 %v329_v2, %v328_v62  ;;  %v336_v10 = vrot.slane %v335_v5, 4 }
  0x74   : > { %v297_v11 = vsel %vm234_vm1, %v289_v6, 0.0  ;;  %v402_v2 = vsub.s32 1, %v909_v23 }
  0x75   : > { %v292_v12 = vadd.f32 %v291_v8, %v290_v4  ;;  %v298_v13 = vrot.slane %v297_v11, 4  ;;  %v331_v14 = vrot.slane %v330_v9, 2  ;;  %v337_v15 = vadd.f32 %v336_v10, %v335_v5 }
  0x77   : > { %v293_v16 = vrot.slane %v292_v12, 2  ;;  %v299_v3 = vadd.f32 %v298_v13, %v297_v11  ;;  %v332_v17 = vadd.f32 %v331_v14, %v330_v9  ;;  %v338_v18 = vrot.slane %v337_v15, 2 }
  0x79   : > { %v294_v19 = vadd.f32 %v293_v16, %v292_v12  ;;  %v300_v20 = vrot.slane %v299_v3, 2  ;;  %v333_v21 = vrot.slane %v332_v17, 1  ;;  %v339_v22 = vadd.f32 %v338_v18, %v337_v15 }
  0x7b   : > { %v295_v24 = vrot.slane %v294_v19, 1  ;;  %v301_v25 = vadd.f32 %v300_v20, %v299_v3  ;;  %v340_v7 = vrot.slane %v339_v22, 1  ;;  %v334_v26 = vadd.f32 %v333_v21, %v332_v17 }
  0x7d   : > { %v296_v27 = vadd.f32 %v295_v24, %v294_v19  ;;  %v302_v28 = vrot.slane %v301_v25, 1  ;;  %v341_v29 = vadd.f32 %v340_v7, %v339_v22  ;;  %594 = vlog2.f32 %v334_v26 }
  0x7e   : > { %596 = vrcp.f32 %v334_v26 }
  0x7f   : > { %v303_v30 = vadd.f32 %v302_v28, %v301_v25  ;;  %v342_v31 = vsub.f32 %v296_v27, %v912_v36  ;;  %598 = vlog2.f32 %v341_v29 }
  0x80   : > { %600 = vrcp.f32 %v341_v29 }
  0x81   : > { %v343_v32 = vsub.f32 %v303_v30, %v914_v39  ;;  %v350_v33 = vmul.f32 1.442695, %v342_v31 }
  0x83   : > { %602 = vpow2.f32 %v350_v33  ;;  %v352_v34 = vmul.f32 1.442695, %v343_v32 }
  0x85   : > { %604 = vpow2.f32 %v352_v34 }
  0x87   : > { %v595_v35 = vpop.eup %594 }
  0x88   : > { %v597_v37 = vpop.eup %596  ;;  %v345_v42 = vmul.f32 0.6931472, %v595_v35 }
  0x89   : > { %v599_v38 = vpop.eup %598 }
  0x8a   : > { %v601_v40 = vpop.eup %600  ;;  %v347_v45 = vmul.f32 0.6931472, %v599_v38  ;;  %v348_v39 = vsub.f32 %v345_v42, %v342_v31 }
  0x8c   : > { %v349_v51 = vsub.f32 %v347_v45, %v343_v32 }
  0x8d   : > { %v603_v41 = vpop.eup %602 }
  0x8e   : > { %v356_v43 = vmul.f32 %v603_v41, %v597_v37 }
  0x8f   : > { %v605_v44 = vpop.eup %604 }
  0x90   : > { %v357_v36 = vmul.f32 %v605_v44, %v601_v40  ;;  %v358_v46 = vsub.f32 1.0, %v356_v43 }
  0x92   : > { %v359_v49 = vsub.f32 1.0, %v357_v36  ;;  %v360_v50 = vmax.f32 %v358_v46, 0.0 }
  0x94   : > { %v361_v52 = vmax.f32 %v359_v49, 0.0  ;;  %v362_v53 = vmul.f32 %v360_v50, %v360_v50 }
  0x96   : > { %v363_v55 = vmul.f32 %v361_v52, %v361_v52  ;;  %v364_v56 = vmul.f32 %v362_v53, %v348_v39 }
  0x98   : > { %v365_v57 = vmul.f32 %v363_v55, %v349_v51 }
  0x9a   : > { %v369_v59 = vcombine.low %v364_v56, %v365_v57 }
  0x9c   : > { %v376_v60 = vrot.slane %v369_v59, %v375_v58 }
  0x9e   : > { %v383_v62 = vrot.slane %v376_v60, %v375_v58 }
  0xa0   : > { %v385_v63 = vadd.f32 %v383_v62, %v366_v61 }
  0xa2   : > { %390 = vst.msk [vmem:[#allocation2] sm:$0x3] %vm891_vm0, %v385_v63 }
  0xa9   : > { %v394_v4 = vld [vmem:[#allocation2] sm:$0x3] }
  0xaa   : > { %v399_v5 = vrot.slane %v394_v4, %v398_v0  ;;  %v403_v6 = vrot.slane %v394_v4, %v402_v2 }
  0xac   : > { %v407_v8 = vsel %vm406_vm11, %v399_v5, 0.0  ;;  %v408_v9 = vsel %vm406_vm11, %v403_v6, 0.0 }
  0xad   : > { %v409_v10 = vadd.f32 %v408_v9, %v407_v8 }
  0xaf   : > { %410 = vadd.xlane.f32.xlu0 %v409_v10 }
 0x13c   : > { %v411_v1 = vpop.xlane.xlu0 %410 }
 0x13d   : > { %413 = vst.msk [vmem:[%s217_s25] sm:$0x1] %vm412_vm12, %v411_v1 }
 0x13e PF: > { %s18_s14 = sadd.s32 1, %s720_s14   ;;  %s974_s9 = smov %s704_s10 }
 0x13f   : > { %p15_p9 = scmp.ge.s32.totalorder %s18_s14, 4   ;;  %s975_s10 = smov %s708_s11 }
 0x140   : > { %s976_s11 = smov %s791_s21  ;;  %s977_s12 = smov %s716_s13 }
 0x141   : > { %s978_s13 = smov %s980_s16  ;;  %17 = sbr.rel (!%p15_p9) target bundleno = 6 (0x6), region = 89 }
 0x148   :  { %431 = vsyncpa [#allocation4], 1 }
 0x149   :  { %433 = vsyncpa [#allocation4 + $0x1], 1 }
 0x14a   :  { %434 = vsyncpa [#allocation6], 1 }
 0x14b   :  { %436 = vsyncpa [#allocation6 + $0x1], 1 }

</bundles_post_ra>
